<compile_context>
chip_gen: v7x
topology: tpu7x:2x2x1
jax: 0.10.0
libtpu: 0.0.40
codegen_flags: <defaults>
</compile_context>

<pallas_src>
import functools

import jax
import jax.numpy as jnp
from jax.experimental import pallas as pl
from jax.experimental.pallas import tpu as pltpu

LANES = 128
SUBLANE = 8
CHUNK_ROWS = 512                  # in-kernel chunk: 512x128 f32 = 256 KiB / temp
TARGET_BLOCK_BYTES = 2 * 1024 * 1024   # ~2 MiB per input pipeline buffer


def _dice_bce_kernel(x_ref, t_ref, o_ref, acc_inter, acc_pt, acc_bce, *,
                     block_rows, chunk_rows, n_chunks, need_mask,
                     valid_rows, rem_cols):
    j = pl.program_id(0)

    @pl.when(j == 0)
    def _():
        acc_inter[...] = jnp.zeros_like(acc_inter)
        acc_pt[...] = jnp.zeros_like(acc_pt)
        acc_bce[...] = jnp.zeros_like(acc_bce)

    def process_chunk(row0):
        x = x_ref[pl.ds(row0, chunk_rows), :].astype(jnp.float32)
        t = t_ref[pl.ds(row0, chunk_rows), :].astype(jnp.float32)

        # Numerically stable sigmoid + BCE-with-logits using only 2 EUP ops:
        #   p  = sigmoid(x) = 0.5 + 0.5*tanh(x/2)              (1 EUP: tanh)
        #   sp = log(1+exp(-|x|)) = -log(max(p, 1-p))           (1 EUP: log)
        #   bce = relu(x) - x*t + sp
        p = 0.5 + 0.5 * jnp.tanh(0.5 * x)
        sp = -jnp.log(jnp.maximum(p, 1.0 - p))
        bce = jnp.maximum(x, 0.0) - x * t + sp

        if need_mask:
            g0 = j * block_rows + row0      # global start row of this chunk

            def masked(p_v, t_v, b_v):
                grow = g0 + jax.lax.broadcasted_iota(
                    jnp.int32, (chunk_rows, LANES), 0)
                col = jax.lax.broadcasted_iota(
                    jnp.int32, (chunk_rows, LANES), 1)
                m = (grow < valid_rows) | ((grow == valid_rows) &
                                           (col < rem_cols))
                z = jnp.zeros_like(p_v)
                return (jnp.where(m, p_v, z), jnp.where(m, t_v, z),
                        jnp.where(m, b_v, z))

            # Only chunks that actually touch padded / out-of-range rows pay.
            p, t, bce = jax.lax.cond(
                g0 + chunk_rows > valid_rows, masked,
                lambda p_v, t_v, b_v: (p_v, t_v, b_v), p, t, bce)

        if chunk_rows % SUBLANE == 0:
            # Fold chunk rows into a vreg-shaped (8,128) partial: pure VPU adds.
            pr = p.reshape(-1, SUBLANE, LANES)
            tr = t.reshape(-1, SUBLANE, LANES)
            br = bce.reshape(-1, SUBLANE, LANES)
            acc_inter[...] += jnp.sum(pr * tr, axis=0)    # intersection
            acc_pt[...] += jnp.sum(pr + tr, axis=0)       # sum(p) + sum(t)
            acc_bce[...] += jnp.sum(br, axis=0)           # BCE sum
        else:
            # Tiny single-block case (rows not a multiple of 8).
            acc_inter[0:1, :] += jnp.sum(p * t, axis=0, keepdims=True)
            acc_pt[0:1, :] += jnp.sum(p + t, axis=0, keepdims=True)
            acc_bce[0:1, :] += jnp.sum(bce, axis=0, keepdims=True)

    if n_chunks == 1:
        process_chunk(0)
    else:
        def body(c, carry):
            process_chunk(pl.multiple_of(c * chunk_rows, SUBLANE))
            return carry
        jax.lax.fori_loop(0, n_chunks, body, 0)

    @pl.when(j == pl.num_programs(0) - 1)
    def _():
        o_ref[0, 0] = jnp.sum(acc_inter[...])
        o_ref[0, 1] = jnp.sum(acc_pt[...])
        o_ref[0, 2] = jnp.sum(acc_bce[...])


def dice_bce_loss(inputs, targets, smooth=1.0):
    """inputs (logits), targets: same shape (e.g. NCHW). Returns scalar f32 loss."""
    total_n = int(inputs.size)
    x = jnp.ravel(inputs)          # free reshape; keep native dtype (bf16/f32)
    t = jnp.ravel(targets)

    rem_cols = total_n % LANES
    rows = (total_n + LANES - 1) // LANES
    if rem_cols:
        # TODO(synk): a sub-128 ragged remainder forces a full-array pad copy;
        # a manual-DMA (memory_space=pl.ANY) variant could avoid it.
        pad = rows * LANES - total_n
        x = jnp.pad(x, (0, pad))
        t = jnp.pad(t, (0, pad))
    x = x.reshape(rows, LANES)     # free when total_n % 128 == 0 (common case)
    t = t.reshape(rows, LANES)

    itemsize = max(x.dtype.itemsize, t.dtype.itemsize)
    max_rows = TARGET_BLOCK_BYTES // (LANES * itemsize)   # 4096 f32 / 8192 bf16
    if rows >= max_rows:
        block_rows = max_rows
    elif rows >= CHUNK_ROWS:
        block_rows = CHUNK_ROWS
    else:
        block_rows = rows          # single block equal to full array extent
    chunk_rows = min(CHUNK_ROWS, block_rows)
    n_chunks = block_rows // chunk_rows
    n_blocks = (rows + block_rows - 1) // block_rows
    need_mask = (rem_cols != 0) or (rows % block_rows != 0)
    valid_rows = total_n // LANES  # number of fully-valid 128-wide rows

    kernel = functools.partial(
        _dice_bce_kernel,
        block_rows=block_rows, chunk_rows=chunk_rows, n_chunks=n_chunks,
        need_mask=need_mask, valid_rows=valid_rows, rem_cols=rem_cols)

    sums = pl.pallas_call(
        kernel,
        out_shape=jax.ShapeDtypeStruct((1, 3), jnp.float32),
        grid_spec=pltpu.PrefetchScalarGridSpec(
            num_scalar_prefetch=0,
            grid=(n_blocks,),
            in_specs=[
                pl.BlockSpec((block_rows, LANES), lambda j: (j, 0)),
                pl.BlockSpec((block_rows, LANES), lambda j: (j, 0)),
            ],
            out_specs=pl.BlockSpec((1, 3), lambda j: (0, 0),
                                   memory_space=pltpu.MemorySpace.SMEM),
            scratch_shapes=[pltpu.VMEM((SUBLANE, LANES), jnp.float32)] * 3,
        ),
        compiler_params=pltpu.CompilerParams(
            dimension_semantics=("arbitrary",),
            vmem_limit_bytes=32 * 1024 * 1024),
    )(x, t)

    inter = sums[0, 0]
    sum_pt = sums[0, 1]
    bce_sum = sums[0, 2]
    dice_loss = 1.0 - (2.0 * inter + smooth) / (sum_pt + smooth)
    return bce_sum / total_n + dice_loss


def _reference(inputs, targets, smooth=1.0):
    # PyTorch semantics: sigmoid -> Dice + BCELoss(mean) with log clamp at -100.
    p = jax.nn.sigmoid(inputs.astype(jnp.float32)).ravel()
    t = targets.astype(jnp.float32).ravel()
    inter = jnp.sum(p * t)
    dice = 1.0 - (2.0 * inter + smooth) / (jnp.sum(p) + jnp.sum(t) + smooth)
    log_p = jnp.maximum(jnp.log(p), -100.0)
    log_1mp = jnp.maximum(jnp.log(1.0 - p), -100.0)
    bce = jnp.mean(-(t * log_p + (1.0 - t) * log_1mp))
    return bce + dice


if __name__ == "__main__":
    key = jax.random.PRNGKey(0)
    k1, k2, k3, k4, k5, k6 = jax.random.split(key, 6)

    # Case 1: NCHW float32 logits (module's typical usage) -- clean path,
    # single block, no masking, zero-copy wrapper.
    B, C, H, W = 2, 4, 16, 16
    x1 = jax.random.normal(k1, (B, C, H, W), dtype=jnp.float32)
    t1 = jax.random.bernoulli(k2, 0.5, (B, C, H, W)).astype(jnp.float32)
    out1 = jax.block_until_ready(dice_bce_loss(x1, t1))
    ref1 = jax.block_until_ready(_reference(x1, t1))
    assert jnp.allclose(out1, ref1, rtol=1e-5, atol=1e-5), (out1, ref1)

    # Case 2: ragged size + bf16 logits (native-dtype path + tail masking).
    x2 = jax.random.normal(k3, (2, 3, 17, 19), dtype=jnp.bfloat16)
    t2 = jax.random.bernoulli(k4, 0.3, (2, 3, 17, 19)).astype(jnp.float32)
    out2 = jax.block_until_ready(dice_bce_loss(x2, t2))
    ref2 = jax.block_until_ready(_reference(x2, t2))
    assert jnp.allclose(out2, ref2, rtol=1e-4, atol=1e-4), (out2, ref2)

    # Case 3: multi-block + in-kernel chunk loop + masked partial last block.
    x3 = jax.random.normal(k5, (2, 4, 260, 256), dtype=jnp.float32)
    t3 = jax.random.bernoulli(k6, 0.4, (2, 4, 260, 256)).astype(jnp.float32)
    out3 = jax.block_until_ready(dice_bce_loss(x3, t3))
    ref3 = jax.block_until_ready(_reference(x3, t3))
    assert jnp.allclose(out3, ref3, rtol=1e-4, atol=1e-4), (out3, ref3)

    print("KERNEL_OK")
</pallas_src>

<mosaic_0001>
module attributes {stable_mosaic.version = 11 : i64} {
  func.func @_dice_bce_kernel(%arg0: i32, %arg1: memref<16x128xf32, #tpu.memory_space<vmem>>, %arg2: memref<16x128xf32, #tpu.memory_space<vmem>>, %arg3: memref<1x3xf32, #tpu.memory_space<smem>>, %arg4: memref<8x128xf32, #tpu.memory_space<vmem>>, %arg5: memref<8x128xf32, #tpu.memory_space<vmem>>, %arg6: memref<8x128xf32, #tpu.memory_space<vmem>>) attributes {dimension_semantics = [#tpu.dimension_semantics<arbitrary>], iteration_bounds = array<i64: 1>, scalar_prefetch = 0 : i64, scratch_operands = 3 : i64, tpu.core_type = #tpu.core_type<tc>, window_params = [{transform_indices = @transform_0, window_bounds = array<i64: 16, 128>}, {transform_indices = @transform_1, window_bounds = array<i64: 16, 128>}, {transform_indices = @transform_2, window_bounds = array<i64: 1, 3>}]} {
    %c0_i32 = arith.constant 0 : i32
    %0 = arith.cmpi eq, %arg0, %c0_i32 : i32
    %1 = arith.extui %0 : i1 to i32
    %c0_i32_0 = arith.constant 0 : i32
    %2 = arith.cmpi ne, %1, %c0_i32_0 : i32
    scf.if %2 {
      %cst_26 = arith.constant 0.000000e+00 : f32
      %43 = vector.broadcast %cst_26 : f32 to vector<8x128xf32>
      %c0_27 = arith.constant 0 : index
      %c0_28 = arith.constant 0 : index
      %44 = vector.load %arg4[%c0_27, %c0_28] : memref<8x128xf32, #tpu.memory_space<vmem>>, vector<8x128xf32>
      tpu.vector_store %arg4[%c0_27, %c0_28], %43 {strides = array<i32>} : memref<8x128xf32, #tpu.memory_space<vmem>>, vector<8x128xf32>,
      %cst_29 = arith.constant 0.000000e+00 : f32
      %45 = vector.broadcast %cst_29 : f32 to vector<8x128xf32>
      %c0_30 = arith.constant 0 : index
      %c0_31 = arith.constant 0 : index
      %46 = vector.load %arg5[%c0_30, %c0_31] : memref<8x128xf32, #tpu.memory_space<vmem>>, vector<8x128xf32>
      tpu.vector_store %arg5[%c0_30, %c0_31], %45 {strides = array<i32>} : memref<8x128xf32, #tpu.memory_space<vmem>>, vector<8x128xf32>,
      %cst_32 = arith.constant 0.000000e+00 : f32
      %47 = vector.broadcast %cst_32 : f32 to vector<8x128xf32>
      %c0_33 = arith.constant 0 : index
      %c0_34 = arith.constant 0 : index
      %48 = vector.load %arg6[%c0_33, %c0_34] : memref<8x128xf32, #tpu.memory_space<vmem>>, vector<8x128xf32>
      tpu.vector_store %arg6[%c0_33, %c0_34], %47 {strides = array<i32>} : memref<8x128xf32, #tpu.memory_space<vmem>>, vector<8x128xf32>,
    } else {
    }
    %c0 = arith.constant 0 : index
    %c0_1 = arith.constant 0 : index
    %3 = vector.load %arg1[%c0, %c0_1] : memref<16x128xf32, #tpu.memory_space<vmem>>, vector<16x128xf32>
    %c0_2 = arith.constant 0 : index
    %c0_3 = arith.constant 0 : index
    %4 = vector.load %arg2[%c0_2, %c0_3] : memref<16x128xf32, #tpu.memory_space<vmem>>, vector<16x128xf32>
    %cst = arith.constant 5.000000e-01 : f32
    %5 = vector.broadcast %cst : f32 to vector<16x128xf32>
    %6 = arith.mulf %5, %3 : vector<16x128xf32>
    %7 = math.tanh %6 : vector<16x128xf32>
    %cst_4 = arith.constant 5.000000e-01 : f32
    %8 = vector.broadcast %cst_4 : f32 to vector<16x128xf32>
    %9 = arith.mulf %8, %7 : vector<16x128xf32>
    %cst_5 = arith.constant 5.000000e-01 : f32
    %10 = vector.broadcast %cst_5 : f32 to vector<16x128xf32>
    %11 = arith.addf %10, %9 : vector<16x128xf32>
    %cst_6 = arith.constant 1.000000e+00 : f32
    %12 = vector.broadcast %cst_6 : f32 to vector<16x128xf32>
    %13 = arith.subf %12, %11 : vector<16x128xf32>
    %14 = arith.maximumf %11, %13 : vector<16x128xf32>
    %15 = math.log %14 : vector<16x128xf32>
    %cst_7 = arith.constant 0.000000e+00 : f32
    %16 = vector.broadcast %cst_7 : f32 to vector<16x128xf32>
    %17 = arith.subf %16, %15 : vector<16x128xf32>
    %cst_8 = arith.constant 0.000000e+00 : f32
    %18 = vector.broadcast %cst_8 : f32 to vector<16x128xf32>
    %19 = arith.maximumf %3, %18 : vector<16x128xf32>
    %20 = arith.mulf %3, %4 : vector<16x128xf32>
    %21 = arith.subf %19, %20 : vector<16x128xf32>
    %22 = arith.addf %21, %17 : vector<16x128xf32>
    %23 = vector.shape_cast %11 : vector<16x128xf32> to vector<2x8x128xf32>
    %24 = vector.shape_cast %4 : vector<16x128xf32> to vector<2x8x128xf32>
    %25 = vector.shape_cast %22 : vector<16x128xf32> to vector<2x8x128xf32>
    %c0_9 = arith.constant 0 : index
    %c0_10 = arith.constant 0 : index
    %26 = vector.load %arg4[%c0_9, %c0_10] : memref<8x128xf32, #tpu.memory_space<vmem>>, vector<8x128xf32>
    %27 = arith.mulf %23, %24 : vector<2x8x128xf32>
    %cst_11 = arith.constant dense<0.000000e+00> : vector<8x128xf32>
    %28 = vector.multi_reduction <add>, %27, %cst_11 [0] : vector<2x8x128xf32> to vector<8x128xf32>
    %29 = arith.addf %26, %28 : vector<8x128xf32>
    %c0_12 = arith.constant 0 : index
    %c0_13 = arith.constant 0 : index
    %30 = vector.load %arg4[%c0_12, %c0_13] : memref<8x128xf32, #tpu.memory_space<vmem>>, vector<8x128xf32>
    tpu.vector_store %arg4[%c0_12, %c0_13], %29 {strides = array<i32>} : memref<8x128xf32, #tpu.memory_space<vmem>>, vector<8x128xf32>,
    %c0_14 = arith.constant 0 : index
    %c0_15 = arith.constant 0 : index
    %31 = vector.load %arg5[%c0_14, %c0_15] : memref<8x128xf32, #tpu.memory_space<vmem>>, vector<8x128xf32>
    %32 = arith.addf %23, %24 : vector<2x8x128xf32>
    %cst_16 = arith.constant dense<0.000000e+00> : vector<8x128xf32>
    %33 = vector.multi_reduction <add>, %32, %cst_16 [0] : vector<2x8x128xf32> to vector<8x128xf32>
    %34 = arith.addf %31, %33 : vector<8x128xf32>
    %c0_17 = arith.constant 0 : index
    %c0_18 = arith.constant 0 : index
    %35 = vector.load %arg5[%c0_17, %c0_18] : memref<8x128xf32, #tpu.memory_space<vmem>>, vector<8x128xf32>
    tpu.vector_store %arg5[%c0_17, %c0_18], %34 {strides = array<i32>} : memref<8x128xf32, #tpu.memory_space<vmem>>, vector<8x128xf32>,
    %c0_19 = arith.constant 0 : index
    %c0_20 = arith.constant 0 : index
    %36 = vector.load %arg6[%c0_19, %c0_20] : memref<8x128xf32, #tpu.memory_space<vmem>>, vector<8x128xf32>
    %cst_21 = arith.constant dense<0.000000e+00> : vector<8x128xf32>
    %37 = vector.multi_reduction <add>, %25, %cst_21 [0] : vector<2x8x128xf32> to vector<8x128xf32>
    %38 = arith.addf %36, %37 : vector<8x128xf32>
    %c0_22 = arith.constant 0 : index
    %c0_23 = arith.constant 0 : index
    %39 = vector.load %arg6[%c0_22, %c0_23] : memref<8x128xf32, #tpu.memory_space<vmem>>, vector<8x128xf32>
    tpu.vector_store %arg6[%c0_22, %c0_23], %38 {strides = array<i32>} : memref<8x128xf32, #tpu.memory_space<vmem>>, vector<8x128xf32>,
    %c0_i32_24 = arith.constant 0 : i32
    %40 = arith.cmpi eq, %arg0, %c0_i32_24 : i32
    %41 = arith.extui %40 : i1 to i32
    %c0_i32_25 = arith.constant 0 : i32
    %42 = arith.cmpi ne, %41, %c0_i32_25 : i32
    scf.if %42 {
      %c0_26 = arith.constant 0 : index
      %c0_27 = arith.constant 0 : index
      %43 = vector.load %arg4[%c0_26, %c0_27] : memref<8x128xf32, #tpu.memory_space<vmem>>, vector<8x128xf32>
      %44 = vector.shape_cast %43 : vector<8x128xf32> to vector<1x8x128xf32>
      %cst_28 = arith.constant dense<0.000000e+00> : vector<1xf32>
      %45 = vector.multi_reduction <add>, %44, %cst_28 [1, 2] : vector<1x8x128xf32> to vector<1xf32>
      %46 = vector.shape_cast %45 : vector<1xf32> to vector<1x1x1xf32>
      %47 = vector.extract %46[0, 0, 0] : f32 from vector<1x1x1xf32>
      %c0_29 = arith.constant 0 : index
      %c0_30 = arith.constant 0 : index
      %48 = memref.load %arg3[%c0_29, %c0_30] : memref<1x3xf32, #tpu.memory_space<smem>>
      memref.store %47, %arg3[%c0_29, %c0_30] : memref<1x3xf32, #tpu.memory_space<smem>>
      %c0_31 = arith.constant 0 : index
      %c0_32 = arith.constant 0 : index
      %49 = vector.load %arg5[%c0_31, %c0_32] : memref<8x128xf32, #tpu.memory_space<vmem>>, vector<8x128xf32>
      %50 = vector.shape_cast %49 : vector<8x128xf32> to vector<1x8x128xf32>
      %cst_33 = arith.constant dense<0.000000e+00> : vector<1xf32>
      %51 = vector.multi_reduction <add>, %50, %cst_33 [1, 2] : vector<1x8x128xf32> to vector<1xf32>
      %52 = vector.shape_cast %51 : vector<1xf32> to vector<1x1x1xf32>
      %53 = vector.extract %52[0, 0, 0] : f32 from vector<1x1x1xf32>
      %c0_34 = arith.constant 0 : index
      %c1 = arith.constant 1 : index
      %54 = memref.load %arg3[%c0_34, %c1] : memref<1x3xf32, #tpu.memory_space<smem>>
      memref.store %53, %arg3[%c0_34, %c1] : memref<1x3xf32, #tpu.memory_space<smem>>
      %c0_35 = arith.constant 0 : index
      %c0_36 = arith.constant 0 : index
      %55 = vector.load %arg6[%c0_35, %c0_36] : memref<8x128xf32, #tpu.memory_space<vmem>>, vector<8x128xf32>
      %56 = vector.shape_cast %55 : vector<8x128xf32> to vector<1x8x128xf32>
      %cst_37 = arith.constant dense<0.000000e+00> : vector<1xf32>
      %57 = vector.multi_reduction <add>, %56, %cst_37 [1, 2] : vector<1x8x128xf32> to vector<1xf32>
      %58 = vector.shape_cast %57 : vector<1xf32> to vector<1x1x1xf32>
      %59 = vector.extract %58[0, 0, 0] : f32 from vector<1x1x1xf32>
      %c0_38 = arith.constant 0 : index
      %c2 = arith.constant 2 : index
      %60 = memref.load %arg3[%c0_38, %c2] : memref<1x3xf32, #tpu.memory_space<smem>>
      memref.store %59, %arg3[%c0_38, %c2] : memref<1x3xf32, #tpu.memory_space<smem>>
    } else {
    }
    return
  }
  func.func @transform_0(%arg0: i32) -> (i32, i32) {
    %c0_i32 = arith.constant 0 : i32
    %c0_i32_0 = arith.constant 0 : i32
    return %arg0, %c0_i32 : i32, i32
  }
  func.func @transform_1(%arg0: i32) -> (i32, i32) {
    %c0_i32 = arith.constant 0 : i32
    %c0_i32_0 = arith.constant 0 : i32
    return %arg0, %c0_i32 : i32, i32
  }
  func.func @transform_2(%arg0: i32) -> (i32, i32) {
    %c0_i32 = arith.constant 0 : i32
    %c0_i32_0 = arith.constant 0 : i32
    %c0_i32_1 = arith.constant 0 : i32
    return %c0_i32, %c0_i32_0 : i32, i32
  }
}

</mosaic_0001>

<bundles_post_ra>
// kernel: tpu_custom_call.1
= control target key start
LH: loop header
LB: loop body
LE: loop exit
PB: predicated region body
PF: predicated region fallthrough
CT: control target
= control target key end

     0   :  { %7 = vsyncpa [#allocation6], 0  ;;  %s282_s0 = inlined_call_operand.hbm [shape: f32[16,128], index: 0, kind: input, shape index: {}]   ;;  %s283_s1 = inlined_call_operand.hbm [shape: f32[16,128], index: 1, kind: input, shape index: {}]   ;;  %s284_s2 = inlined_call_operand.hbm [shape: f32[1,3], index: 2, kind: output, shape index: {}]  }
   0x1   :  { %8 = vsyncpa [#allocation9], 0 }
   0x2   :  { %9 = vsyncpa [#allocation7], 0  ;;  %s226_s9 = smov [#allocation5]   ;;  %s166_s13 = scalar_lea.hbm %s282_s0, 256 }
   0x3   :  { %s15_s10 = sshll.u32 %s226_s9, 4  ;;  %p167_p0 = scmp.ne.s32.totalorder %s282_s0, %s166_s13  ;;  %s16_s10 = int_to_ptr.vmem [resolvable:$true] %s15_s10 }
   0x4   :  { %p170_p1 = scmp.lt.u32.totalorder %s166_s13, %s282_s0 }
   0x6   :  { %p172_p2 = pnand %p170_p1, %p167_p0 }
   0x8   :  { %175 = shalt.err (!%p172_p2)
}
   0x9   :  { %s176_s18 = scalar_lea.vmem %s16_s10, 256  ;;  %p181_p4 = scmp.lt.s32.totalorder %s16_s10, %s16_s10 }
   0xa   :  { %p177_p3 = scmp.ne.s32.totalorder %s16_s10, %s176_s18  ;;  %p182_p5 = scmp.lt.s32.totalorder %s176_s18, %s176_s18 }
   0xc   :  { %p183_p6 = por %p182_p5, %p181_p4 }
   0xe   :  { %p184_p7 = pnand %p183_p6, %p177_p3 }
  0x10   :  { %187 = shalt.err (!%p184_p7)
}
  0x11   :  { %s227_s19 = smov 128   ;;  %s228_s20 = smov 8  }
  0x12   :  { %21 = dma.hbm_to_vmem [thread:$0]  %s282_s0, 256, %s16_s10, [#allocation6], %s227_s19, %s227_s19, %s228_s20  }
  0x13   :  { %s229_s23 = smov [#allocation8]   ;;  %s188_s27 = scalar_lea.hbm %s283_s1, 256 }
  0x14   :  { %s27_s24 = sshll.u32 %s229_s23, 4  ;;  %p189_p8 = scmp.ne.s32.totalorder %s283_s1, %s188_s27  ;;  %s28_s24 = int_to_ptr.vmem [resolvable:$true] %s27_s24 }
  0x15   :  { %p192_p9 = scmp.lt.u32.totalorder %s188_s27, %s283_s1 }
  0x17   :  { %p194_p10 = pnand %p192_p9, %p189_p8 }
  0x19   :  { %197 = shalt.err (!%p194_p10)
}
  0x1a   :  { %s198_s4 = scalar_lea.vmem %s28_s24, 256  ;;  %p203_p12 = scmp.lt.s32.totalorder %s28_s24, %s28_s24 }
  0x1b   :  { %p199_p11 = scmp.ne.s32.totalorder %s28_s24, %s198_s4  ;;  %p204_p13 = scmp.lt.s32.totalorder %s198_s4, %s198_s4 }
  0x1d   :  { %p205_p0 = por %p204_p13, %p203_p12 }
  0x1f   :  { %p206_p1 = pnand %p205_p0, %p199_p11 }
  0x21   :  { %209 = shalt.err (!%p206_p1)
}
  0x22   :  { %33 = dma.hbm_to_vmem [thread:$0]  %s283_s1, 256, %s28_s24, [#allocation9], %s227_s19, %s227_s19, %s228_s20  }
  0x23   :  { %220 = dma.done.wait [#allocation6], 256  }
  0x24   :  { %221 = vsyncadd [#allocation6], 4294967040 }
  0x25   :  { %222 = dma.done.wait [#allocation9], 256  }
  0x26   :  { %223 = vsyncadd [#allocation9], 4294967040  ;;  %v47_v0 = vld [vmem:[#allocation5] sm:$0xff]  ;;  %v48_v1 = vld [vmem:[#allocation5 + $0x8] sm:$0xff]  ;;  %s210_s10 = scalar_lea.hbm %s284_s2, 16 }
  0x27   :  { %v51_v2 = vmul.f32 0.5, %v47_v0  ;;  %v52_v3 = vmul.f32 0.5, %v48_v1  ;;  %v49_v7 = vld [vmem:[#allocation8] sm:$0xff]  ;;  %v50_v9 = vld [vmem:[#allocation8 + $0x8] sm:$0xff]  ;;  %v69_v22 = vmax.f32 %v47_v0, 0.0  ;;  %v70_v24 = vmax.f32 %v48_v1, 0.0  ;;  %p211_p2 = scmp.ne.s32.totalorder %s284_s2, %s210_s10  ;;  %p214_p3 = scmp.lt.u32.totalorder %s210_s10, %s284_s2 }
  0x28   :  { %v71_v23 = vmul.f32 %v49_v7, %v47_v0  ;;  %v72_v25 = vmul.f32 %v50_v9, %v48_v1 }
  0x29   :  { %158 = vtanh.f32 %v51_v2  ;;  %p216_p4 = pnand %p214_p3, %p211_p2 }
  0x2a   :  { %160 = vtanh.f32 %v52_v3  ;;  %v73_v29 = vsub.f32 %v69_v22, %v71_v23  ;;  %v74_v31 = vsub.f32 %v70_v24, %v72_v25 }
  0x33   :  { %v159_v4 = vpop.eup %158 }
  0x34   :  { %v161_v5 = vpop.eup %160  ;;  %v55_v6 = vmul.f32 0.5, %v159_v4 }
  0x35   :  { %v56_v8 = vmul.f32 0.5, %v161_v5 }
  0x36   :  { %v57_v10 = vadd.f32 0.5, %v55_v6 }
  0x37   :  { %v58_v11 = vadd.f32 0.5, %v56_v8 }
  0x38   :  { %v78_v12 = vmul.f32 %v57_v10, %v49_v7  ;;  %v59_v13 = vsub.f32 1.0, %v57_v10  ;;  %v84_v15 = vadd.f32 %v57_v10, %v49_v7 }
  0x39   :  { %v79_v14 = vmul.f32 %v58_v11, %v50_v9  ;;  %v85_v16 = vadd.f32 %v58_v11, %v50_v9  ;;  %v60_v17 = vsub.f32 1.0, %v58_v11 }
  0x3a   :  { %v61_v18 = vmax.f32 %v57_v10, %v59_v13 }
  0x3b   :  { %v80_v19 = vadd.f32 %v79_v14, %v78_v12  ;;  %v62_v20 = vmax.f32 %v58_v11, %v60_v17  ;;  %v86_v21 = vadd.f32 %v85_v16, %v84_v15 }
  0x3c   :  { %162 = vlog2.f32 %v61_v18 }
  0x3d   :  { %97 = vadd.xlane.f32.xlu0 %v80_v19  ;;  %164 = vlog2.f32 %v62_v20 }
  0x41   :  { %109 = vadd.xlane.f32.xlu0 %v86_v21 }
  0x46   :  { %v163_v26 = vpop.eup %162 }
  0x47   :  { %v165_v27 = vpop.eup %164  ;;  %v64_v28 = vmul.f32 0.6931472, %v163_v26 }
  0x48   :  { %v66_v30 = vmul.f32 0.6931472, %v165_v27 }
  0x49   :  { %v67_v32 = vsub.f32 0.0, %v64_v28 }
  0x4a   :  { %v68_v33 = vsub.f32 0.0, %v66_v30 }
  0x4b   :  { %v75_v34 = vadd.f32 %v73_v29, %v67_v32 }
  0x4c   :  { %v76_v35 = vadd.f32 %v74_v31, %v68_v33 }
  0x4e   :  { %v90_v36 = vadd.f32 %v76_v35, %v75_v34 }
  0x50   :  { %121 = vadd.xlane.f32.xlu1 %v90_v36 }
  0xca   :  { %v98_v37 = vpop.xlane.xlu0 %97 }
  0xcb   :  { %v99_v38 = vrot.slane %v98_v37, 4 }
  0xcd   :  { %v100_v39 = vadd.f32 %v99_v38, %v98_v37 }
  0xce   :  { %v110_v40 = vpop.xlane.xlu0 %109 }
  0xcf   :  { %v101_v41 = vrot.slane %v100_v39, 2  ;;  %v111_v42 = vrot.slane %v110_v40, 4 }
  0xd1   :  { %v112_v43 = vadd.f32 %v111_v42, %v110_v40  ;;  %v102_v44 = vadd.f32 %v101_v41, %v100_v39 }
  0xd3   :  { %v113_v45 = vrot.slane %v112_v43, 2  ;;  %v103_v46 = vrot.slane %v102_v44, 1 }
  0xd5   :  { %v114_v47 = vadd.f32 %v113_v45, %v112_v43  ;;  %v104_v48 = vadd.f32 %v103_v46, %v102_v44 }
  0xd7   :  { %147 = vpush %v104_v48  ;;  %v115_v49 = vrot.slane %v114_v47, 1 }
  0xd9   :  { %v116_v50 = vadd.f32 %v115_v49, %v114_v47 }
  0xdb   :  { %149 = vpush %v116_v50 }
  0xdd   :  { %v122_v51 = vpop.xlane.xlu1 %121 }
  0xde   :  { %v123_v52 = vrot.slane %v122_v51, 4 }
  0xe0   :  { %v124_v53 = vadd.f32 %v123_v52, %v122_v51 }
  0xe2   :  { %v125_v54 = vrot.slane %v124_v53, 2 }
  0xe4   :  { %v126_v55 = vadd.f32 %v125_v54, %v124_v53 }
  0xe6   :  { %v127_v56 = vrot.slane %v126_v55, 1 }
  0xe8   :  { %v128_v57 = vadd.f32 %v127_v56, %v126_v55 }
  0xea   :  { %151 = vpush %v128_v57 }
 0x108   :  { %s148_s1 = spop %147 }
 0x109   :  { %107 = sst [smem:[#allocation10]] %s148_s1 }
 0x10c   :  { %s150_s6 = spop %149 }
 0x10d   :  { %119 = sst [smem:[#allocation10 + $0x1]] %s150_s6 }
 0x11b   :  { %s152_s7 = spop %151 }
 0x11c   :  { %131 = sst [smem:[#allocation10 + $0x2]] %s152_s7 }
 0x11d   :  { %219 = shalt.err (!%p216_p4)
}
 0x11e   :  { %s230_s15 = smov [#allocation10]  }
 0x11f   :  { %139 = dma.smem_to_hbm %s230_s15, 16, %s284_s2, [#allocation7]  }
 0x120   :  { %224 = dma.done.wait [#allocation7], 16  }
 0x121   :  { %225 = vsyncadd [#allocation7], 4294967280 }
 0x122   :  { %143 = sfence }
 0x123   :  { %144 = vsyncpa [#allocation6], 1 }
 0x124   :  { %145 = vsyncpa [#allocation9], 1 }
 0x125   :  { %146 = vsyncpa [#allocation7], 1 }

</bundles_post_ra>
